<compile_context>
chip_gen: v7x
topology: tpu7x:2x2x1
jax: 0.10.0
libtpu: 0.0.40
codegen_flags: <defaults>
</compile_context>

<pallas_src>
import jax
import jax.numpy as jnp
from jax.experimental import pallas as pl
from jax.experimental.pallas import tpu as pltpu

EPS = 1e-5            # PyTorch InstanceNorm2d default eps
LEAKY_SLOPE = 0.2     # LeakyReLU(0.2)


# ---------------------------------------------------------------------------
# Small helpers
# ---------------------------------------------------------------------------
def _leaky_relu(s):
    # maximum(s, 0.2*s) == LeakyReLU(0.2) since 0 < slope < 1 (one vmax, no select).
    return jnp.maximum(s, LEAKY_SLOPE * s)


def _inorm_rows(y):
    """Exact InstanceNorm over the lane (spatial) axis of a (C, HW) f32 tile."""
    mu = jnp.mean(y, axis=-1, keepdims=True)
    yc = y - mu
    var = jnp.mean(yc * yc, axis=-1, keepdims=True)
    return yc * jax.lax.rsqrt(var + EPS)


def _vmem_capacity_bytes():
    """Generation-aware VMEM capacity (v5e/v6e 128 MiB, v7x 64 MiB), safe fallback."""
    try:
        info = pltpu.get_tpu_info()
        cap = getattr(info, "vmem_capacity_bytes", None)
        if cap:
            return int(cap)
    except Exception:
        pass
    return 64 << 20


def _pad8(c):
    return -(-c // 8) * 8


def _single_pass_vmem_bytes(HW, Cg, Cx, Cint, g_bytes, x_bytes, out_bytes):
    lanes = -(-HW // 128) * 128
    io = 2 * lanes * (_pad8(Cg) * g_bytes + _pad8(Cx) * x_bytes + _pad8(Cx) * out_bytes)
    inter = 6 * _pad8(Cint) * lanes * 4          # g1/x1/centered copies/s in f32
    return io + inter


def _tiled_vmem_bytes(T, Cg, Cx, Cint, g_bytes, x_bytes, out_bytes):
    lanes = -(-T // 128) * 128
    io = 2 * lanes * (_pad8(Cg) * g_bytes + _pad8(Cx) * x_bytes
                      + _pad8(Cx) * out_bytes + 8 * 4)   # + psi_raw f32 row
    inter = 6 * _pad8(Cint) * lanes * 4
    return io + inter + (2 << 20)


def _pick_tile(HW, target):
    """Largest multiple of 128 that divides HW and is <= target; else the whole row."""
    t = min(target, HW)
    t -= t % 128
    while t >= 128:
        if HW % t == 0:
            return t
        t -= 128
    return HW


# ---------------------------------------------------------------------------
# Single-pass kernel (whole sample resident in VMEM)
# ---------------------------------------------------------------------------
def _gate_single_pass_kernel(g_ref, x_ref, wg_ref, bg_ref, wx_ref, bx_ref,
                             wpsi_ref, bpsi_ref, out_ref):
    g = g_ref[...]                                   # (Cg, HW)
    x = x_ref[...]                                   # (Cx, HW)

    # 1x1 convs as MXU matmuls (bf16 x bf16 -> f32 acc when activations are bf16).
    g1 = jnp.dot(wg_ref[...], g, preferred_element_type=jnp.float32) + bg_ref[...]
    x1 = jnp.dot(wx_ref[...], x, preferred_element_type=jnp.float32) + bx_ref[...]

    # LeakyReLU(0.2)(IN(g1) + IN(x1))
    s = _leaky_relu(_inorm_rows(g1) + _inorm_rows(x1))            # (Cint, HW) f32

    # psi: Cint -> 1 projection on the (idle) MXU; bias is an SMEM scalar.
    psi = jnp.dot(wpsi_ref[...], s, preferred_element_type=jnp.float32) + bpsi_ref[0]

    # InstanceNorm2d(1) + Sigmoid, then gate the skip connection (lane-dense store).
    psi = jax.nn.sigmoid(_inorm_rows(psi))                        # (1, HW)
    out_ref[...] = (x * psi).astype(out_ref.dtype)


def _attention_gate_single(g_flat, x_flat, wg, bg, wx, bx, wpsi, bpsi,
                           out_dtype, vmem_limit):
    N, Cg, HW = g_flat.shape
    _, Cx, _ = x_flat.shape
    Cint = wg.shape[0]
    fixed = lambda n: (0, 0)
    per_n = lambda n: (n, 0, 0)

    return pl.pallas_call(
        _gate_single_pass_kernel,
        out_shape=jax.ShapeDtypeStruct((N, Cx, HW), out_dtype),
        grid=(N,),
        in_specs=[
            pl.BlockSpec((None, Cg, HW), per_n),                  # g (batch squeezed)
            pl.BlockSpec((None, Cx, HW), per_n),                  # x
            pl.BlockSpec((Cint, Cg), fixed),                      # W_g
            pl.BlockSpec((Cint, 1), fixed),                       # b_g
            pl.BlockSpec((Cint, Cx), fixed),                      # W_x
            pl.BlockSpec((Cint, 1), fixed),                       # b_x
            pl.BlockSpec((1, Cint), fixed),                       # w_psi
            pl.BlockSpec(memory_space=pltpu.MemorySpace.SMEM),    # b_psi scalar
        ],
        out_specs=pl.BlockSpec((None, Cx, HW), per_n),
        compiler_params=pltpu.CompilerParams(
            dimension_semantics=("parallel",),
            vmem_limit_bytes=vmem_limit),
    )(g_flat, x_flat, wg, bg, wx, bx, wpsi, bpsi)


# ---------------------------------------------------------------------------
# HW-tiled two-pass InstanceNorm path (three streaming pallas_calls)
# ---------------------------------------------------------------------------
def _attention_gate_tiled(g_flat, x_flat, wg, bg, wx, bx, wpsi, bpsi,
                          out_dtype, tile, vmem_limit):
    N, Cg, HW = g_flat.shape
    _, Cx, _ = x_flat.shape
    Cint = wg.shape[0]
    nt = HW // tile
    inv_hw = 1.0 / float(HW)

    fixed = lambda n, t: (0, 0)
    per_sample = lambda n, t: (n, 0, 0)
    per_tile = lambda n, t: (n, 0, t)

    # --- pass 1: per-channel sum / sumsq of g1, x1; finalized to (mean, rstd) -----
    def stats_kernel(g_ref, x_ref, wg_ref, bg_ref, wx_ref, bx_ref,
                     gstats_ref, xstats_ref):
        t = pl.program_id(1)

        @pl.when(t == 0)
        def _():
            gstats_ref[...] = jnp.zeros_like(gstats_ref)
            xstats_ref[...] = jnp.zeros_like(xstats_ref)

        g1 = jnp.dot(wg_ref[...], g_ref[...],
                     preferred_element_type=jnp.float32) + bg_ref[...]
        x1 = jnp.dot(wx_ref[...], x_ref[...],
                     preferred_element_type=jnp.float32) + bx_ref[...]
        gstats_ref[:, 0:1] += jnp.sum(g1, axis=-1, keepdims=True)
        gstats_ref[:, 1:2] += jnp.sum(g1 * g1, axis=-1, keepdims=True)
        xstats_ref[:, 0:1] += jnp.sum(x1, axis=-1, keepdims=True)
        xstats_ref[:, 1:2] += jnp.sum(x1 * x1, axis=-1, keepdims=True)

        @pl.when(t == pl.num_programs(1) - 1)
        def _():
            for ref in (gstats_ref, xstats_ref):
                mean = ref[:, 0:1] * inv_hw
                var = ref[:, 1:2] * inv_hw - mean * mean
                ref[:, 0:1] = mean
                ref[:, 1:2] = jax.lax.rsqrt(jnp.maximum(var, 0.0) + EPS)

    gstats, xstats = pl.pallas_call(
        stats_kernel,
        out_shape=(jax.ShapeDtypeStruct((N, Cint, 2), jnp.float32),
                   jax.ShapeDtypeStruct((N, Cint, 2), jnp.float32)),
        grid=(N, nt),
        in_specs=[
            pl.BlockSpec((None, Cg, tile), per_tile),
            pl.BlockSpec((None, Cx, tile), per_tile),
            pl.BlockSpec((Cint, Cg), fixed),
            pl.BlockSpec((Cint, 1), fixed),
            pl.BlockSpec((Cint, Cx), fixed),
            pl.BlockSpec((Cint, 1), fixed),
        ],
        out_specs=(pl.BlockSpec((None, Cint, 2), per_sample),
                   pl.BlockSpec((None, Cint, 2), per_sample)),
        compiler_params=pltpu.CompilerParams(
            dimension_semantics=("parallel", "arbitrary"),
            vmem_limit_bytes=vmem_limit),
    )(g_flat, x_flat, wg, bg, wx, bx)

    # --- pass 2: normalize + LeakyReLU + psi projection; carry psi stats ----------
    def psi_kernel(g_ref, x_ref, wg_ref, bg_ref, wx_ref, bx_ref,
                   gstats_ref, xstats_ref, wpsi_ref, bpsi_ref,
                   praw_ref, pstats_ref):
        t = pl.program_id(1)

        @pl.when(t == 0)
        def _():
            pstats_ref[...] = jnp.zeros_like(pstats_ref)

        g1 = jnp.dot(wg_ref[...], g_ref[...],
                     preferred_element_type=jnp.float32) + bg_ref[...]
        x1 = jnp.dot(wx_ref[...], x_ref[...],
                     preferred_element_type=jnp.float32) + bx_ref[...]
        gs = gstats_ref[...]
        xs = xstats_ref[...]
        s = (g1 - gs[:, 0:1]) * gs[:, 1:2] + (x1 - xs[:, 0:1]) * xs[:, 1:2]
        s = _leaky_relu(s)
        psi = jnp.dot(wpsi_ref[...], s,
                      preferred_element_type=jnp.float32) + bpsi_ref[0]   # (1, T)
        praw_ref[...] = psi
        pstats_ref[:, 0:1] += jnp.sum(psi, axis=-1, keepdims=True)
        pstats_ref[:, 1:2] += jnp.sum(psi * psi, axis=-1, keepdims=True)

        @pl.when(t == pl.num_programs(1) - 1)
        def _():
            mean = pstats_ref[:, 0:1] * inv_hw
            var = pstats_ref[:, 1:2] * inv_hw - mean * mean
            pstats_ref[:, 0:1] = mean
            pstats_ref[:, 1:2] = jax.lax.rsqrt(jnp.maximum(var, 0.0) + EPS)

    praw, pstats = pl.pallas_call(
        psi_kernel,
        out_shape=(jax.ShapeDtypeStruct((N, 1, HW), jnp.float32),
                   jax.ShapeDtypeStruct((N, 1, 2), jnp.float32)),
        grid=(N, nt),
        in_specs=[
            pl.BlockSpec((None, Cg, tile), per_tile),
            pl.BlockSpec((None, Cx, tile), per_tile),
            pl.BlockSpec((Cint, Cg), fixed),
            pl.BlockSpec((Cint, 1), fixed),
            pl.BlockSpec((Cint, Cx), fixed),
            pl.BlockSpec((Cint, 1), fixed),
            pl.BlockSpec((None, Cint, 2), per_sample),
            pl.BlockSpec((None, Cint, 2), per_sample),
            pl.BlockSpec((1, Cint), fixed),
            pl.BlockSpec(memory_space=pltpu.MemorySpace.SMEM),
        ],
        out_specs=(pl.BlockSpec((None, 1, tile), per_tile),
                   pl.BlockSpec((None, 1, 2), per_sample)),
        compiler_params=pltpu.CompilerParams(
            dimension_semantics=("parallel", "arbitrary"),
            vmem_limit_bytes=vmem_limit),
    )(g_flat, x_flat, wg, bg, wx, bx, gstats, xstats, wpsi, bpsi)

    # --- pass 3: psi IN + sigmoid + gating (fully parallel; lane-dense stores) ----
    def gate_kernel(x_ref, praw_ref, pstats_ref, out_ref):
        mean = pstats_ref[:, 0:1]
        rstd = pstats_ref[:, 1:2]
        psi = jax.nn.sigmoid((praw_ref[...] - mean) * rstd)       # (1, T)
        out_ref[...] = (x_ref[...] * psi).astype(out_ref.dtype)

    out_flat = pl.pallas_call(
        gate_kernel,
        out_shape=jax.ShapeDtypeStruct((N, Cx, HW), out_dtype),
        grid=(N, nt),
        in_specs=[
            pl.BlockSpec((None, Cx, tile), per_tile),
            pl.BlockSpec((None, 1, tile), per_tile),
            pl.BlockSpec((None, 1, 2), per_sample),
        ],
        out_specs=pl.BlockSpec((None, Cx, tile), per_tile),
        compiler_params=pltpu.CompilerParams(
            dimension_semantics=("parallel", "parallel"),
            vmem_limit_bytes=vmem_limit),
    )(x_flat, praw, pstats)
    return out_flat


# ---------------------------------------------------------------------------
# Public wrapper
# ---------------------------------------------------------------------------
def attention_gate(g_nchw, x_nchw, params, *, tile_target=4096, force_tiled=False):
    """g_nchw: (N, Cg, H, W), x_nchw: (N, Cx, H, W). Returns (N, Cx, H, W)."""
    N, Cg, H, W = g_nchw.shape
    _, Cx, _, _ = x_nchw.shape
    HW = H * W
    Cint = params["wg"].shape[0]

    # NCHW -> (N, C, HW): a free reshape (channels-first already), HW stays lane-dense.
    g_flat = g_nchw.reshape(N, Cg, HW)
    x_flat = x_nchw.reshape(N, Cx, HW)

    # Matmul weights in the activation dtype (native bf16 MXU path when inputs are
    # bf16); biases / psi weight stay f32 — all post-matmul math is f32.
    wg = params["wg"].astype(g_nchw.dtype)                 # (Cint, Cg)
    wx = params["wx"].astype(x_nchw.dtype)                 # (Cint, Cx)
    bg = params["bg"].astype(jnp.float32).reshape(Cint, 1)
    bx = params["bx"].astype(jnp.float32).reshape(Cint, 1)
    wpsi = params["wpsi"].astype(jnp.float32).reshape(1, Cint)
    bpsi = params["bpsi"].astype(jnp.float32).reshape(1)   # SMEM scalar
    out_dtype = x_nchw.dtype

    g_b = jnp.dtype(g_nchw.dtype).itemsize
    x_b = jnp.dtype(x_nchw.dtype).itemsize
    cap = _vmem_capacity_bytes()
    headroom = 12 << 20                                    # compiler internal scratch

    single_bytes = _single_pass_vmem_bytes(HW, Cg, Cx, Cint, g_b, x_b, x_b)
    if force_tiled or single_bytes > cap - headroom:
        tile = _pick_tile(HW, tile_target)
        vmem_limit = int(min(cap - (8 << 20),
                             max(32 << 20,
                                 _tiled_vmem_bytes(tile, Cg, Cx, Cint, g_b, x_b, x_b))))
        out_flat = _attention_gate_tiled(g_flat, x_flat, wg, bg, wx, bx, wpsi, bpsi,
                                         out_dtype, tile, vmem_limit)
    else:
        vmem_limit = int(min(cap - (8 << 20),
                             max(32 << 20, single_bytes + (8 << 20))))
        out_flat = _attention_gate_single(g_flat, x_flat, wg, bg, wx, bx, wpsi, bpsi,
                                          out_dtype, vmem_limit)

    return out_flat.reshape(N, Cx, H, W)


# ---------------------------------------------------------------------------
# Pure-JAX reference (verification) and parameter init
# ---------------------------------------------------------------------------
def attention_gate_ref(g_nchw, x_nchw, params):
    N, Cg, H, W = g_nchw.shape
    _, Cx, _, _ = x_nchw.shape
    g = g_nchw.reshape(N, Cg, H * W).astype(jnp.float32)
    x = x_nchw.reshape(N, Cx, H * W).astype(jnp.float32)

    def inorm(y):  # biased variance, no affine (InstanceNorm2d defaults)
        mu = jnp.mean(y, axis=-1, keepdims=True)
        var = jnp.mean((y - mu) ** 2, axis=-1, keepdims=True)
        return (y - mu) * jax.lax.rsqrt(var + EPS)

    g1 = inorm(jnp.einsum('oc,ncs->nos', params["wg"], g) + params["bg"][None, :, None])
    x1 = inorm(jnp.einsum('oc,ncs->nos', params["wx"], x) + params["bx"][None, :, None])
    s = g1 + x1
    s = jnp.where(s >= 0, s, LEAKY_SLOPE * s)
    psi = inorm(jnp.einsum('oc,ncs->nos', params["wpsi"], s) + params["bpsi"][None, :, None])
    psi = jax.nn.sigmoid(psi)
    return (x * psi).reshape(N, Cx, H, W)


def init_params(key, in_channels_g, in_channels_x, inter_channels):
    ks = jax.random.split(key, 6)
    f32 = jnp.float32
    return {
        "wg": 0.2 * jax.random.normal(ks[0], (inter_channels, in_channels_g), f32),
        "bg": 0.1 * jax.random.normal(ks[1], (inter_channels,), f32),
        "wx": 0.2 * jax.random.normal(ks[2], (inter_channels, in_channels_x), f32),
        "bx": 0.1 * jax.random.normal(ks[3], (inter_channels,), f32),
        "wpsi": 0.2 * jax.random.normal(ks[4], (1, inter_channels), f32),
        "bpsi": 0.1 * jax.random.normal(ks[5], (1,), f32),
    }


if __name__ == "__main__":
    key = jax.random.PRNGKey(0)

    # --- case 1: small f32 level, single-pass (whole-sample-resident) path --------
    N, Cg, Cx, Cint, H, W = 2, 4, 4, 8, 16, 16
    kg, kx, kp, k2 = jax.random.split(key, 4)
    g = jax.random.normal(kg, (N, Cg, H, W), jnp.float32)
    x = jax.random.normal(kx, (N, Cx, H, W), jnp.float32)
    params = init_params(kp, Cg, Cx, Cint)

    out = jax.block_until_ready(attention_gate(g, x, params))
    ref = attention_gate_ref(g, x, params)
    assert out.shape == (N, Cx, H, W)
    assert jnp.allclose(out, ref, atol=1e-2, rtol=1e-2), "single-pass mismatch"

    # --- case 2: bf16 activations through the same path (halved HBM I/O) ----------
    g16, x16 = g.astype(jnp.bfloat16), x.astype(jnp.bfloat16)
    out16 = jax.block_until_ready(attention_gate(g16, x16, params))
    ref16 = attention_gate_ref(g16.astype(jnp.float32), x16.astype(jnp.float32), params)
    assert out16.dtype == jnp.bfloat16
    assert jnp.allclose(out16.astype(jnp.float32), ref16, atol=5e-2, rtol=5e-2), \
        "bf16 mismatch"

    # --- case 3: force the HW-tiled two-pass InstanceNorm path (large-level path) --
    N2, Cg2, Cx2, Cint2, H2, W2 = 1, 6, 4, 8, 32, 32
    kg2, kx2, kp2 = jax.random.split(k2, 3)
    g2 = jax.random.normal(kg2, (N2, Cg2, H2, W2), jnp.float32)
    x2 = jax.random.normal(kx2, (N2, Cx2, H2, W2), jnp.float32)
    params2 = init_params(kp2, Cg2, Cx2, Cint2)
    out2 = jax.block_until_ready(
        attention_gate(g2, x2, params2, tile_target=256, force_tiled=True))
    ref2 = attention_gate_ref(g2, x2, params2)
    assert out2.shape == (N2, Cx2, H2, W2)
    assert jnp.allclose(out2, ref2, atol=1e-2, rtol=1e-2), "tiled-path mismatch"

    print("KERNEL_OK")
</pallas_src>

<mosaic_0001>
module attributes {stable_mosaic.version = 11 : i64} {
  func.func @_gate_single_pass_kernel(%arg0: i32, %arg1: memref<1x4x256xf32, #tpu.memory_space<vmem>>, %arg2: memref<1x4x256xf32, #tpu.memory_space<vmem>>, %arg3: memref<8x4xf32, #tpu.memory_space<vmem>>, %arg4: memref<8x1xf32, #tpu.memory_space<vmem>>, %arg5: memref<8x4xf32, #tpu.memory_space<vmem>>, %arg6: memref<8x1xf32, #tpu.memory_space<vmem>>, %arg7: memref<1x8xf32, #tpu.memory_space<vmem>>, %arg8: memref<1xf32, #tpu.memory_space<smem>>, %arg9: memref<1x4x256xf32, #tpu.memory_space<vmem>>) attributes {dimension_semantics = [#tpu.dimension_semantics<parallel>], iteration_bounds = array<i64: 2>, scalar_prefetch = 0 : i64, scratch_operands = 0 : i64, tpu.core_type = #tpu.core_type<tc>, window_params = [{transform_indices = @transform_0, window_bounds = array<i64: 1, 4, 256>}, {transform_indices = @transform_1, window_bounds = array<i64: 1, 4, 256>}, {pipeline_mode = #tpu.pipeline_mode<synchronous>, transform_indices = @transform_2, window_bounds = array<i64: 8, 4>}, {pipeline_mode = #tpu.pipeline_mode<synchronous>, transform_indices = @transform_3, window_bounds = array<i64: 8, 1>}, {pipeline_mode = #tpu.pipeline_mode<synchronous>, transform_indices = @transform_4, window_bounds = array<i64: 8, 4>}, {pipeline_mode = #tpu.pipeline_mode<synchronous>, transform_indices = @transform_5, window_bounds = array<i64: 8, 1>}, {pipeline_mode = #tpu.pipeline_mode<synchronous>, transform_indices = @transform_6, window_bounds = array<i64: 1, 8>}, {transform_indices = @transform_7, window_bounds = array<i64: 1>}, {transform_indices = @transform_8, window_bounds = array<i64: 1, 4, 256>}]} {
    %c0 = arith.constant 0 : index
    %c0_0 = arith.constant 0 : index
    %c0_1 = arith.constant 0 : index
    %0 = vector.load %arg1[%c0, %c0_0, %c0_1] : memref<1x4x256xf32, #tpu.memory_space<vmem>>, vector<1x4x256xf32>
    %1 = vector.shape_cast %0 : vector<1x4x256xf32> to vector<4x256xf32>
    %c0_2 = arith.constant 0 : index
    %c0_3 = arith.constant 0 : index
    %c0_4 = arith.constant 0 : index
    %2 = vector.load %arg2[%c0_2, %c0_3, %c0_4] : memref<1x4x256xf32, #tpu.memory_space<vmem>>, vector<1x4x256xf32>
    %3 = vector.shape_cast %2 : vector<1x4x256xf32> to vector<4x256xf32>
    %c0_5 = arith.constant 0 : index
    %c0_6 = arith.constant 0 : index
    %4 = vector.load %arg3[%c0_5, %c0_6] : memref<8x4xf32, #tpu.memory_space<vmem>>, vector<8x4xf32>
    %cst = arith.constant dense<0.000000e+00> : vector<8x256xf32>
    %5 = tpu.matmul %4, %1, %cst {dimension_numbers = #tpu.dot_dimension_numbers<[1], [0], [0], [1], [0, 0, 1, 1], [], []>} : vector<8x4xf32>, vector<4x256xf32>, vector<8x256xf32> -> vector<8x256xf32>
    %c0_7 = arith.constant 0 : index
    %c0_8 = arith.constant 0 : index
    %6 = vector.load %arg4[%c0_7, %c0_8] : memref<8x1xf32, #tpu.memory_space<vmem>>, vector<8x1xf32>
    %7 = vector.broadcast %6 : vector<8x1xf32> to vector<8x256xf32>
    %8 = arith.addf %5, %7 : vector<8x256xf32>
    %c0_9 = arith.constant 0 : index
    %c0_10 = arith.constant 0 : index
    %9 = vector.load %arg5[%c0_9, %c0_10] : memref<8x4xf32, #tpu.memory_space<vmem>>, vector<8x4xf32>
    %cst_11 = arith.constant dense<0.000000e+00> : vector<8x256xf32>
    %10 = tpu.matmul %9, %3, %cst_11 {dimension_numbers = #tpu.dot_dimension_numbers<[1], [0], [0], [1], [0, 0, 1, 1], [], []>} : vector<8x4xf32>, vector<4x256xf32>, vector<8x256xf32> -> vector<8x256xf32>
    %c0_12 = arith.constant 0 : index
    %c0_13 = arith.constant 0 : index
    %11 = vector.load %arg6[%c0_12, %c0_13] : memref<8x1xf32, #tpu.memory_space<vmem>>, vector<8x1xf32>
    %12 = vector.broadcast %11 : vector<8x1xf32> to vector<8x256xf32>
    %13 = arith.addf %10, %12 : vector<8x256xf32>
    %cst_14 = arith.constant dense<0.000000e+00> : vector<8xf32>
    %14 = vector.multi_reduction <add>, %8, %cst_14 [1] : vector<8x256xf32> to vector<8xf32>
    %15 = vector.shape_cast %14 : vector<8xf32> to vector<8x1xf32>
    %cst_15 = arith.constant 2.560000e+02 : f32
    %16 = vector.broadcast %cst_15 : f32 to vector<8x1xf32>
    %17 = arith.divf %15, %16 : vector<8x1xf32>
    %18 = vector.broadcast %17 : vector<8x1xf32> to vector<8x256xf32>
    %19 = arith.subf %8, %18 : vector<8x256xf32>
    %20 = arith.mulf %19, %19 : vector<8x256xf32>
    %cst_16 = arith.constant dense<0.000000e+00> : vector<8xf32>
    %21 = vector.multi_reduction <add>, %20, %cst_16 [1] : vector<8x256xf32> to vector<8xf32>
    %22 = vector.shape_cast %21 : vector<8xf32> to vector<8x1xf32>
    %cst_17 = arith.constant 2.560000e+02 : f32
    %23 = vector.broadcast %cst_17 : f32 to vector<8x1xf32>
    %24 = arith.divf %22, %23 : vector<8x1xf32>
    %cst_18 = arith.constant 9.99999974E-6 : f32
    %25 = vector.broadcast %cst_18 : f32 to vector<8x1xf32>
    %26 = arith.addf %24, %25 : vector<8x1xf32>
    %27 = math.rsqrt %26 : vector<8x1xf32>
    %28 = vector.broadcast %27 : vector<8x1xf32> to vector<8x256xf32>
    %29 = arith.mulf %19, %28 : vector<8x256xf32>
    %cst_19 = arith.constant dense<0.000000e+00> : vector<8xf32>
    %30 = vector.multi_reduction <add>, %13, %cst_19 [1] : vector<8x256xf32> to vector<8xf32>
    %31 = vector.shape_cast %30 : vector<8xf32> to vector<8x1xf32>
    %cst_20 = arith.constant 2.560000e+02 : f32
    %32 = vector.broadcast %cst_20 : f32 to vector<8x1xf32>
    %33 = arith.divf %31, %32 : vector<8x1xf32>
    %34 = vector.broadcast %33 : vector<8x1xf32> to vector<8x256xf32>
    %35 = arith.subf %13, %34 : vector<8x256xf32>
    %36 = arith.mulf %35, %35 : vector<8x256xf32>
    %cst_21 = arith.constant dense<0.000000e+00> : vector<8xf32>
    %37 = vector.multi_reduction <add>, %36, %cst_21 [1] : vector<8x256xf32> to vector<8xf32>
    %38 = vector.shape_cast %37 : vector<8xf32> to vector<8x1xf32>
    %cst_22 = arith.constant 2.560000e+02 : f32
    %39 = vector.broadcast %cst_22 : f32 to vector<8x1xf32>
    %40 = arith.divf %38, %39 : vector<8x1xf32>
    %cst_23 = arith.constant 9.99999974E-6 : f32
    %41 = vector.broadcast %cst_23 : f32 to vector<8x1xf32>
    %42 = arith.addf %40, %41 : vector<8x1xf32>
    %43 = math.rsqrt %42 : vector<8x1xf32>
    %44 = vector.broadcast %43 : vector<8x1xf32> to vector<8x256xf32>
    %45 = arith.mulf %35, %44 : vector<8x256xf32>
    %46 = arith.addf %29, %45 : vector<8x256xf32>
    %cst_24 = arith.constant 2.000000e-01 : f32
    %47 = vector.broadcast %cst_24 : f32 to vector<8x256xf32>
    %48 = arith.mulf %47, %46 : vector<8x256xf32>
    %49 = arith.maximumf %46, %48 : vector<8x256xf32>
    %c0_25 = arith.constant 0 : index
    %c0_26 = arith.constant 0 : index
    %50 = vector.load %arg7[%c0_25, %c0_26] : memref<1x8xf32, #tpu.memory_space<vmem>>, vector<1x8xf32>
    %cst_27 = arith.constant dense<0.000000e+00> : vector<1x256xf32>
    %51 = tpu.matmul %50, %49, %cst_27 {dimension_numbers = #tpu.dot_dimension_numbers<[1], [0], [0], [1], [0, 0, 1, 1], [], []>} : vector<1x8xf32>, vector<8x256xf32>, vector<1x256xf32> -> vector<1x256xf32>
    %c0_28 = arith.constant 0 : index
    %52 = memref.load %arg8[%c0_28] : memref<1xf32, #tpu.memory_space<smem>>
    %53 = vector.broadcast %52 : f32 to vector<1x256xf32>
    %54 = arith.addf %51, %53 : vector<1x256xf32>
    %cst_29 = arith.constant dense<0.000000e+00> : vector<1xf32>
    %55 = vector.multi_reduction <add>, %54, %cst_29 [1] : vector<1x256xf32> to vector<1xf32>
    %56 = vector.shape_cast %55 : vector<1xf32> to vector<1x1xf32>
    %cst_30 = arith.constant 2.560000e+02 : f32
    %57 = vector.broadcast %cst_30 : f32 to vector<1x1xf32>
    %58 = arith.divf %56, %57 : vector<1x1xf32>
    %59 = vector.broadcast %58 : vector<1x1xf32> to vector<1x256xf32>
    %60 = arith.subf %54, %59 : vector<1x256xf32>
    %61 = arith.mulf %60, %60 : vector<1x256xf32>
    %cst_31 = arith.constant dense<0.000000e+00> : vector<1xf32>
    %62 = vector.multi_reduction <add>, %61, %cst_31 [1] : vector<1x256xf32> to vector<1xf32>
    %63 = vector.shape_cast %62 : vector<1xf32> to vector<1x1xf32>
    %cst_32 = arith.constant 2.560000e+02 : f32
    %64 = vector.broadcast %cst_32 : f32 to vector<1x1xf32>
    %65 = arith.divf %63, %64 : vector<1x1xf32>
    %cst_33 = arith.constant 9.99999974E-6 : f32
    %66 = vector.broadcast %cst_33 : f32 to vector<1x1xf32>
    %67 = arith.addf %65, %66 : vector<1x1xf32>
    %68 = math.rsqrt %67 : vector<1x1xf32>
    %69 = vector.broadcast %68 : vector<1x1xf32> to vector<1x256xf32>
    %70 = arith.mulf %60, %69 : vector<1x256xf32>
    %71 = arith.negf %70 : vector<1x256xf32>
    %72 = math.exp %71 : vector<1x256xf32>
    %cst_34 = arith.constant 1.000000e+00 : f32
    %73 = vector.broadcast %cst_34 : f32 to vector<1x256xf32>
    %74 = arith.addf %73, %72 : vector<1x256xf32>
    %75 = arith.divf %73, %74 : vector<1x256xf32>
    %76 = vector.broadcast %75 : vector<1x256xf32> to vector<4x256xf32>
    %77 = arith.mulf %3, %76 : vector<4x256xf32>
    %c0_35 = arith.constant 0 : index
    %c0_36 = arith.constant 0 : index
    %c0_37 = arith.constant 0 : index
    %78 = vector.load %arg9[%c0_35, %c0_36, %c0_37] : memref<1x4x256xf32, #tpu.memory_space<vmem>>, vector<1x4x256xf32>
    %79 = vector.shape_cast %78 : vector<1x4x256xf32> to vector<4x256xf32>
    %80 = vector.shape_cast %77 : vector<4x256xf32> to vector<1x4x256xf32>
    tpu.vector_store %arg9[%c0_35, %c0_36, %c0_37], %80 {strides = array<i32>} : memref<1x4x256xf32, #tpu.memory_space<vmem>>, vector<1x4x256xf32>,
    return
  }
  func.func @transform_0(%arg0: i32) -> (i32, i32, i32) {
    %c0_i32 = arith.constant 0 : i32
    %c0_i32_0 = arith.constant 0 : i32
    %c0_i32_1 = arith.constant 0 : i32
    return %arg0, %c0_i32, %c0_i32_0 : i32, i32, i32
  }
  func.func @transform_1(%arg0: i32) -> (i32, i32, i32) {
    %c0_i32 = arith.constant 0 : i32
    %c0_i32_0 = arith.constant 0 : i32
    %c0_i32_1 = arith.constant 0 : i32
    return %arg0, %c0_i32, %c0_i32_0 : i32, i32, i32
  }
  func.func @transform_2(%arg0: i32) -> (i32, i32) {
    %c0_i32 = arith.constant 0 : i32
    %c0_i32_0 = arith.constant 0 : i32
    %c0_i32_1 = arith.constant 0 : i32
    return %c0_i32, %c0_i32_0 : i32, i32
  }
  func.func @transform_3(%arg0: i32) -> (i32, i32) {
    %c0_i32 = arith.constant 0 : i32
    %c0_i32_0 = arith.constant 0 : i32
    %c0_i32_1 = arith.constant 0 : i32
    return %c0_i32, %c0_i32_0 : i32, i32
  }
  func.func @transform_4(%arg0: i32) -> (i32, i32) {
    %c0_i32 = arith.constant 0 : i32
    %c0_i32_0 = arith.constant 0 : i32
    %c0_i32_1 = arith.constant 0 : i32
    return %c0_i32, %c0_i32_0 : i32, i32
  }
  func.func @transform_5(%arg0: i32) -> (i32, i32) {
    %c0_i32 = arith.constant 0 : i32
    %c0_i32_0 = arith.constant 0 : i32
    %c0_i32_1 = arith.constant 0 : i32
    return %c0_i32, %c0_i32_0 : i32, i32
  }
  func.func @transform_6(%arg0: i32) -> (i32, i32) {
    %c0_i32 = arith.constant 0 : i32
    %c0_i32_0 = arith.constant 0 : i32
    %c0_i32_1 = arith.constant 0 : i32
    return %c0_i32, %c0_i32_0 : i32, i32
  }
  func.func @transform_7(%arg0: i32) -> i32 {
    %c0_i32 = arith.constant 0 : i32
    %c0_i32_0 = arith.constant 0 : i32
    return %c0_i32 : i32
  }
  func.func @transform_8(%arg0: i32) -> (i32, i32, i32) {
    %c0_i32 = arith.constant 0 : i32
    %c0_i32_0 = arith.constant 0 : i32
    %c0_i32_1 = arith.constant 0 : i32
    return %arg0, %c0_i32, %c0_i32_0 : i32, i32, i32
  }
}

</mosaic_0001>

<bundles_post_ra>
// kernel: tpu_custom_call.1
= control target key start
LH: loop header
LB: loop body
LE: loop exit
PB: predicated region body
PF: predicated region fallthrough
CT: control target
= control target key end

     0   :  { %s1076_s0 = inlined_call_operand.vmem [shape: f32[2,4,256], index: 0, kind: input, shape index: {}]   ;;  %s1077_s1 = inlined_call_operand.vmem [shape: f32[2,4,256], index: 1, kind: input, shape index: {}]   ;;  %s1078_s2 = inlined_call_operand.vmem [shape: f32[8,4], index: 2, kind: input, shape index: {}]   ;;  %s1079_s3 = inlined_call_operand.vmem [shape: f32[8,1], index: 3, kind: input, shape index: {}]   ;;  %s1080_s4 = inlined_call_operand.vmem [shape: f32[8,4], index: 4, kind: input, shape index: {}]   ;;  %s1081_s5 = inlined_call_operand.vmem [shape: f32[8,1], index: 5, kind: input, shape index: {}]   ;;  %s1082_s6 = inlined_call_operand.vmem [shape: f32[1,8], index: 6, kind: input, shape index: {}]   ;;  %s1083_s7 = inlined_call_operand.<no memory space> [shape: f32[1], index: 7, kind: input, shape index: {}]   ;;  %s1084_s8 = inlined_call_operand.hbm [shape: f32[2,4,256], index: 8, kind: output, shape index: {}]  }
   0x1   :  { %13 = sst [smem:[#allocation2]] %s1083_s7 }
   0x2   :  { %14 = vsyncpa [#allocation4], 0 }
   0x3   :  { %16 = vsyncpa [#allocation4 + $0x1], 0  ;;  %s952_s29 = smov 0   ;;  %s954_s30 = smov 0  }
   0x4   :  { %s956_s9 = smov 0   ;;  %s958_s10 = smov 0  }
   0x5 LB: > { %s973_s7 = sadd.s32 4294967295, %s899_s10   ;;  %s753_s11 = sadd.s32 4294967294, %s899_s10   ;;  %s899_s10 = sphi %s958_s10, %s1090_s10   ;;  %s895_s9 = sphi %s956_s9, %s1089_s9   ;;  %s891_s30 = sphi %s954_s30, %s1088_s30   ;;  %s887_s29 = sphi %s952_s29, %s1087_s29  }
   0x6   : > { %s977_s12 = sadd.s32 1, %s899_s10   ;;  %s207_s13 = sadd.s32 1, %s895_s9 }
   0x7   : > { %s204_s14 = ssub.s32 %s899_s10, %s977_s12  ;;  %p217_p0 = scmp.ne.s32.totalorder %s895_s9, %s891_s30 }
   0x8   : > { %p205_p1 = scmp.eq.s32.totalorder %s204_s14, 0  ;;  %p218_p2 = scmp.eq.s32.totalorder %s973_s7, 1 }
   0x9   : > { %p223_p3 = scmp.ne.s32.totalorder %s891_s30, %s887_s29  ;;  %p224_p4 = scmp.eq.s32.totalorder %s753_s11, 1 }
   0xa   : > { %s988_s15 = scalar_select %p205_p1, %s895_s9, %s207_s13  }
   0xb   : > { %p990_p5 = por %p218_p2, %p217_p0  ;;  %p994_p6 = por %p224_p4, %p223_p3 }
   0xc   : > { %p756_p7 = scmp.ge.s32.totalorder %s899_s10, 1  ;;  %p276_p8 = scmp.lt.s32.totalorder %s899_s10, 3 }
   0xe   : > { %p277_p9 = pnand %p756_p7, %p276_p8 }
   0xf   : > { %p315_p10 = scmp.lt.s32.totalorder (!%p277_p9), %s973_s7, 1  ;;  %v901_v0 = vmov (!%p277_p9), 0.0   ;;  %v328_v1 = vld [vmem:[%s1079_s3] sm:$0xff] (!%p277_p9)  ;;  %v902_v2 = vmov (!%p277_p9), 0   ;;  %vm340_vm0 = vcmask (!%p277_p9), 1043456   ;;  %vm336_vm1 = vcmask (!%p277_p9), 31744  }
  0x10   : > { %280 = sbr.rel (%p277_p9) target bundleno = 1145 (0x479), region = 52  ;;  %409 = vmatprep.mubr.f32.mxu0 (!%p277_p9), %v901_v0  ;;  %496 = vmatprep.mubr.f32.mxu1 (!%p277_p9), %v901_v0  ;;  %v417_v3 = vld [vmem:[%s1081_s5] sm:$0xff] (!%p277_p9)  ;;  %vm545_vm2 = vcmask (!%p277_p9), 64512   ;;  %s543_s22 = sld [smem:[#allocation2]] (!%p277_p9)  ;;  %vm620_vm3 = vcmask (!%p277_p9), 1040384  }
  0x11   : > { %820 = vset.pattern.permute.xlu0 (!%p277_p9), %v902_v2  ;;  %v327_v8 = vld [vmem:[%s1078_s2] sm:$0xff] (!%p277_p9)  ;;  %s312_s23 = sand.u32 (!%p277_p9), 1, %s891_s30   ;;  %s778_s25 = sshll.u32 (!%p277_p9), %s973_s7, 7 }
  0x12   : > { %331 = vperm.xlu0 (!%p277_p9), %820, %v328_v1   ;;  %v416_v9 = vld [vmem:[%s1080_s4] sm:$0xff] (!%p277_p9)  ;;  %s757_s24 = sshll.u32 (!%p277_p9), %s312_s23, 3  ;;  %s1034_s13 = scalar_lea.hbm (!%p277_p9), %s1084_s8, %s778_s25 }
  0x13   : > { %v542_v54 = vld [vmem:[%s1082_s6] sm:$0x1] (!%p277_p9)  ;;  %s668_s14 = scalar_lea.sflag (!%p277_p9), [#allocation4], %s312_s23 }
  0x16   : > { %420 = vperm.xlu0 (!%p277_p9), %820, %v417_v3   ;;  %v544_v55 = vstv (!%p277_p9), %s543_s22 }
  0x17   : > { %s316_s20 = scalar_select %p315_p10, %s973_s7, 1 }
  0x18   : > { %s903_s7 = smov [#allocation3]  }
  0x19   : > { %s776_s21 = sshll.u32 %s316_s20, 3  ;;  %s841_s19 = sshll.u32 %s903_s7, 4  ;;  %s842_s19 = int_to_ptr.vmem [resolvable:$false] %s841_s19 }
  0x1a   : > { %s319_s26 = scalar_lea.vmem %s1076_s0, %s776_s21  ;;  %s324_s11 = scalar_lea.vmem %s1077_s1, %s776_s21 }
  0x1b   : > { %v325_v4 = vld [vmem:[%s319_s26] sm:$0xff]  ;;  %s314_s26 = scalar_lea.vmem [#allocation3], %s757_s24  ;;  %s843_s20 = scalar_lea.vmem %s842_s19, 256 }
  0x1c   : > { %v1014_v5 = vld [vmem:[%s324_s11] sm:$0xff]  ;;  %v335_v6 = vcombine.high %v325_v4, %v325_v4  ;;  %s682_s27 = sshll.u32 %s314_s26, 4  ;;  %s1036_s27 = int_to_ptr.vmem [resolvable:$true] %s682_s27 }
  0x1d   : > { %v424_v7 = vcombine.high %v1014_v5, %v1014_v5  ;;  %s837_s18 = scalar_lea.vmem %s1036_s27, 128  ;;  %p844_p0 = scmp.lt.s32.totalorder %s1036_s27, %s842_s19 }
  0x1e   : > { %762 = vmatprep.subr.msk.mxu0 %vm340_vm0, %v335_v6  ;;  %p838_p11 = scmp.ne.s32.totalorder %s1036_s27, %s837_s18  ;;  %p845_p1 = scmp.lt.s32.totalorder %s843_s20, %s837_s18 }
  0x1f   : > { %765 = vmatprep.subr.msk.mxu1 %vm340_vm0, %v424_v7  ;;  %763 = vmatpush1.msk.msra.mxu0 %vm340_vm0, %v325_v4 }
  0x20   : > { %766 = vmatpush1.msk.msra.mxu1 %vm340_vm0, %v1014_v5  ;;  %764 = vmatmul.mubr.msk.f32.vlgmr.msra.gmra.mrb[0].mxu0 %vm336_vm1, %v327_v8  ;;  %p839_p12 = pnand %p838_p11, %p990_p5  ;;  %p846_p2 = por %p845_p1, %p844_p0 }
  0x21   : > { %767 = vmatmul.mubr.msk.f32.vlgmr.msra.gmra.mrb[0].mxu1 %vm336_vm1, %v416_v9  ;;  %613 = vmatprep.mubr.f32.mxu0 %v901_v0 }
  0x22   : > { %p840_p13 = pneg %p839_p12 }
  0x24   : > { %p847_p3 = pnand %p846_p2, %p840_p13 }
  0x91   : > { %v332_v10 = vpop.permute.xlu0 %331 }
  0x95   : > { %v421_v11 = vpop.permute.xlu0 %420 }
  0xf3   : > { %v411_v12 = vpop.f32.mrb[0].mxu0 }
  0xf4   : > { %v498_v13 = vpop.f32.mrb[0].mxu1  ;;  %v412_v14 = vadd.f32 %v411_v12, %v332_v10  ;;  %v413_v15 = vpop.f32.mrb[1].mxu0 }
  0xf5   : > { %v500_v16 = vpop.f32.mrb[1].mxu1  ;;  %v414_v17 = vadd.f32 %v413_v15, %v332_v10  ;;  %v499_v18 = vadd.f32 %v498_v13, %v421_v11 }
  0xf6   : > { %v501_v19 = vadd.f32 %v500_v16, %v421_v11 }
  0xf7   : > { %v503_v20 = vadd.f32 %v414_v17, %v412_v14 }
  0xf8   : > { %v520_v21 = vadd.f32 %v501_v19, %v499_v18 }
  0xf9   : > { %504 = vadd.xlane.f32.xlu1 %v503_v20 }
  0xfd   : > { %521 = vadd.xlane.f32.xlu1 %v520_v21  ;;  %v653_v21 = vlaneseq }
 0x186   : > { %v505_v22 = vpop.xlane.xlu1 %504 }
 0x187   : > { %v507_v23 = vmul.f32 0.00390625, %v505_v22  ;;  %v654_v22 = vshrl.u32 %v653_v21, 7 }
 0x189   : > { %v508_v24 = vsub.f32 %v412_v14, %v507_v23  ;;  %v509_v25 = vsub.f32 %v414_v17, %v507_v23  ;;  %v655_v23 = vsub.s32 0, %v654_v22 }
 0x18a   : > { %v522_v26 = vpop.xlane.xlu1 %521 }
 0x18b   : > { %v523_v27 = vmul.f32 0.00390625, %v522_v26  ;;  %v510_v28 = vmul.f32 %v508_v24, %v508_v24  ;;  %v511_v29 = vmul.f32 %v509_v25, %v509_v25 }
 0x18d   : > { %v524_v30 = vsub.f32 %v499_v18, %v523_v27  ;;  %v525_v31 = vsub.f32 %v501_v19, %v523_v27  ;;  %v512_v32 = vadd.f32 %v511_v29, %v510_v28 }
 0x18f   : > { %513 = vadd.xlane.f32.xlu0 %v512_v32  ;;  %v526_v33 = vmul.f32 %v524_v30, %v524_v30  ;;  %v527_v34 = vmul.f32 %v525_v31, %v525_v31 }
 0x191   : > { %v528_v35 = vadd.f32 %v527_v34, %v526_v33 }
 0x193   : > { %529 = vadd.xlane.f32.xlu1 %v528_v35 }
 0x21c   : > { %v514_v36 = vpop.xlane.xlu0 %513 }
 0x21d   : > { %v515_v37 = vmul.f32 0.00390625, %v514_v36 }
 0x21f   : > { %v516_v38 = vadd.f32 1e-05, %v515_v37 }
 0x220   : > { %v530_v39 = vpop.xlane.xlu1 %529 }
 0x221   : > { %v531_v40 = vmul.f32 0.00390625, %v530_v39  ;;  %823 = vrsqrt.f32 %v516_v38 }
 0x223   : > { %v532_v41 = vadd.f32 1e-05, %v531_v40 }
 0x225   : > { %825 = vrsqrt.f32 %v532_v41 }
 0x22b   : > { %v824_v42 = vpop.eup %823 }
 0x22c   : > { %v519_v44 = vmul.f32 %v824_v42, %v509_v25  ;;  %v518_v46 = vmul.f32 %v824_v42, %v508_v24 }
 0x22f   : > { %v826_v43 = vpop.eup %825 }
 0x230   : > { %v535_v45 = vmul.f32 %v826_v43, %v525_v31  ;;  %v534_v47 = vmul.f32 %v826_v43, %v524_v30 }
 0x232   : > { %v537_v48 = vadd.f32 %v535_v45, %v519_v44  ;;  %v536_v49 = vadd.f32 %v534_v47, %v518_v46 }
 0x234   : > { %v539_v50 = vmul.f32 0.2, %v537_v48  ;;  %v538_v51 = vmul.f32 0.2, %v536_v49 }
 0x236   : > { %v541_v52 = vmax.f32 %v537_v48, %v539_v50  ;;  %v540_v53 = vmax.f32 %v536_v49, %v538_v51 }
 0x238   : > { %549 = vmatprep.subr.mxu0 %v541_v52 }
 0x239   : > { %550 = vmatpush1.msra.mxu0 %v540_v53 }
 0x23a   : > { %768 = vmatmul.mubr.msk.f32.vlgmr.msra.gmra.mrb[2].mxu0 %vm545_vm2, %v542_v54 }
 0x30d   : > { %v615_v56 = vpop.f32.mrb[2].mxu0 }
 0x30e   : > { %v616_v57 = vadd.f32 %v615_v56, %v544_v55  ;;  %v617_v58 = vpop.f32.mrb[3].mxu0 }
 0x30f   : > { %v618_v59 = vadd.f32 %v617_v58, %v544_v55 }
 0x310   : > { %v621_v60 = vsel %vm620_vm3, %v616_v57, 0.0 }
 0x311   : > { %v622_v61 = vsel %vm620_vm3, %v618_v59, 0.0 }
 0x312   : > { %v623_v62 = vadd.f32 %v622_v61, %v621_v60 }
 0x314   : > { %624 = vadd.xlane.f32.xlu1 %v623_v62 }
 0x3a1   : > { %v625_v63 = vpop.xlane.xlu1 %624 }
 0x3a2   : > { %v626_v0 = vmul.f32 0.00390625, %v625_v63 }
 0x3a4   : > { %v627_v1 = vsub.f32 %v616_v57, %v626_v0  ;;  %v628_v2 = vsub.f32 %v618_v59, %v626_v0 }
 0x3a6   : > { %v629_v3 = vmul.f32 %v627_v1, %v627_v1  ;;  %v630_v4 = vmul.f32 %v628_v2, %v628_v2 }
 0x3a8   : > { %v631_v6 = vsel %vm620_vm3, %v629_v3, 0.0  ;;  %v632_v7 = vsel %vm620_vm3, %v630_v4, 0.0 }
 0x3a9   : > { %v633_v8 = vadd.f32 %v632_v7, %v631_v6 }
 0x3ab   : > { %634 = vadd.xlane.f32.xlu1 %v633_v8 }
 0x438   : > { %v635_v9 = vpop.xlane.xlu1 %634 }
 0x439   : > { %v636_v10 = vmul.f32 0.00390625, %v635_v9 }
 0x43b   : > { %v637_v11 = vadd.f32 1e-05, %v636_v10 }
 0x43d   : > { %827 = vrsqrt.f32 %v637_v11 }
 0x447   : > { %v828_v12 = vpop.eup %827 }
 0x448   : > { %v639_v13 = vmul.f32 %v828_v12, %v627_v1  ;;  %v640_v14 = vmul.f32 %v828_v12, %v628_v2 }
 0x44a   : > { %v769_v15 = vmul.f32 -1.442695, %v639_v13  ;;  %v770_v16 = vmul.f32 -1.442695, %v640_v14 }
 0x44c   : > { %829 = vpow2.f32 %v769_v15 }
 0x44d   : > { %831 = vpow2.f32 %v770_v16 }
 0x456   : > { %v830_v17 = vpop.eup %829 }
 0x457   : > { %v832_v18 = vpop.eup %831  ;;  %v647_v19 = vadd.f32 1.0, %v830_v17 }
 0x458   : > { %v648_v20 = vadd.f32 1.0, %v832_v18 }
 0x459   : > { %833 = vrcp.f32 %v647_v19 }
 0x45a   : > { %835 = vrcp.f32 %v648_v20 }
 0x463   : > { %v834_v24 = vpop.eup %833 }
 0x464   : > { %v836_v25 = vpop.eup %835  ;;  %v656_v26 = vrot.slane %v834_v24, %v655_v23 }
 0x465   : > { %v660_v27 = vrot.slane %v836_v25, %v655_v23 }
 0x467   : > { %v663_v28 = vcombine.low %v656_v26, %v660_v27 }
 0x469   : > { %v665_v29 = vmul.f32 %v663_v28, %v1014_v5 }
 0x46b   : > { %666 = vst [vmem:[%s314_s26] sm:$0xff] %v665_v29 }
 0x46c   : > { %850 = shalt.err (!%p847_p3)
}
 0x46d   : > { %s851_s21 = scalar_lea.hbm %s1034_s13, 128  ;;  %s855_s24 = scalar_lea.hbm %s1084_s8, 256 }
 0x46e   : > { %p852_p4 = scmp.ne.s32.totalorder %s1034_s13, %s851_s21  ;;  %p856_p9 = scmp.lt.u32.totalorder %s1034_s13, %s1084_s8 }
 0x46f   : > { %p857_p10 = scmp.lt.u32.totalorder %s855_s24, %s851_s21  ;;  %p859_p12 = scmp.lt.u32.totalorder %s851_s21, %s1034_s13 }
 0x470   : > { %p853_p7 = pnand %p852_p4, %p990_p5 }
 0x471   : > { %p858_p11 = por %p857_p10, %p856_p9 }
 0x472   : > { %p854_p8 = pneg %p853_p7 }
 0x473   : > { %p860_p13 = por %p859_p12, %p858_p11 }
 0x475   : > { %p861_p0 = pnand %p860_p13, %p854_p8 }
 0x477   : > { %864 = shalt.err (!%p861_p0)
}
 0x478   : > { %779 = dma.vmem_to_hbm [thread:$0]  (%p990_p5), %s1036_s27, 128, %s1034_s13, %s668_s14  }
 0x479 PF: > { %p785_p1 = scmp.ge.s32.totalorder %s899_s10, 2  ;;  %s694_s28 = sand.u32 1, %s887_s29  }
 0x47a   : > { %s695_s11 = scalar_lea.sflag [#allocation4], %s694_s28 }
 0x47b   : > { %p782_p2 = pnand %p785_p1, %p994_p6 }
 0x47d   : > { %882 = dma.done.wait (!%p782_p2), %s695_s11, 128  }
 0x47e   : > { %884 = vsyncadd (!%p782_p2), %s695_s11, 4294967168  ;;  %p19_p3 = scmp.ge.s32.totalorder %s977_s12, 4   ;;  %s1087_s29 = smov %s891_s30 }
 0x47f   : > { %s1088_s30 = smov %s895_s9  ;;  %s1089_s9 = smov %s988_s15 }
 0x480   : > { %s1090_s10 = smov %s977_s12  ;;  %21 = sbr.rel (!%p19_p3) target bundleno = 5 (0x5), region = 90 }
 0x487   :  { %700 = vsyncpa [#allocation4], 1 }
 0x488   :  { %702 = vsyncpa [#allocation4 + $0x1], 1 }

</bundles_post_ra>
